<compile_context>
chip_gen: v6e
topology: v6e:2x2x1
jax: 0.10.0
libtpu: 0.0.40
codegen_flags: <defaults>
</compile_context>

<pallas_src>
import jax
import jax.numpy as jnp
from jax.experimental import pallas as pl
from jax.experimental.pallas import tpu as pltpu


def relu_conv1x1_kernel(x_ref, w_ref, o_ref):
    # x_ref: (Cin+1, M)  -- channels on sublanes (8 rows, aligned), spatial on lanes
    #                       last row is ones (bias lane), ReLU(1) == 1 keeps it.
    # w_ref: (Cout, Cin+1) -- last column is the bias.
    # o_ref: (Cout, M)
    x = jnp.maximum(x_ref[...], 0.0)                                  # ReLU (VPU)
    o_ref[...] = jnp.dot(w_ref[...], x,                               # MXU, bias folded in
                         preferred_element_type=jnp.float32)


@jax.jit
def relu_conv1x1(x_nchw, weight, bias):
    """ReLU -> 1x1 conv. x_nchw: (N, Cin, H, W) f32; weight: (Cout, Cin); bias: (Cout,)."""
    N, Cin, H, W = x_nchw.shape
    Cout = weight.shape[0]
    M = N * H * W

    # Channel-major view (Cin, N*H*W).  Free reshape for N == 1 (the module's shape).
    # TODO(synk): for N > 1 this moveaxis materializes a transpose; grid over N instead.
    x_cm = jnp.moveaxis(x_nchw.reshape(N, Cin, H * W), 1, 0).reshape(Cin, M)

    # Fold bias into the contraction: append a ones row to X and bias column to W.
    # For Cin = 7 this also makes K = 8 (exact sublane multiple).
    x_aug = jnp.concatenate([x_cm, jnp.ones((1, M), x_cm.dtype)], axis=0)   # (Cin+1, M)
    w_aug = jnp.concatenate([weight, bias[:, None]], axis=1)                # (Cout, Cin+1)

    K = Cin + 1
    out = pl.pallas_call(
        relu_conv1x1_kernel,
        out_shape=jax.ShapeDtypeStruct((Cout, M), jnp.float32),
        in_specs=[
            pl.BlockSpec(memory_space=pltpu.MemorySpace.VMEM),
            pl.BlockSpec(memory_space=pltpu.MemorySpace.VMEM),
        ],
        out_specs=pl.BlockSpec(memory_space=pltpu.MemorySpace.VMEM),
        cost_estimate=pl.CostEstimate(
            flops=2 * Cout * K * M,
            bytes_accessed=4 * (K * M + Cout * K + Cout * M),
            transcendentals=0,
        ),
    )(x_aug, w_aug)

    # (Cout, N*H*W) -> (N, Cout, H, W); free for N == 1.
    out = out.reshape(Cout, N, H, W)
    return jnp.moveaxis(out, 0, 1)


if __name__ == "__main__":
    key = jax.random.PRNGKey(0)
    kx, kw, kb = jax.random.split(key, 3)

    # Shapes implied by the module: x = randn(1, 7, 10, 10), Conv2d(7, 3, 1).
    N, Cin, H, W, Cout = 1, 7, 10, 10, 3
    x = jax.random.normal(kx, (N, Cin, H, W), dtype=jnp.float32)

    # Deterministic Conv2d-style init: U(-1/sqrt(fan_in), 1/sqrt(fan_in)).
    bound = 1.0 / jnp.sqrt(jnp.float32(Cin * 1 * 1))
    weight = jax.random.uniform(kw, (Cout, Cin), jnp.float32, -bound, bound)
    bias = jax.random.uniform(kb, (Cout,), jnp.float32, -bound, bound)

    out = relu_conv1x1(x, weight, bias)
    out = jax.block_until_ready(out)

    # Reference check against plain JAX (ReLU then 1x1 conv + bias).
    ref = jnp.einsum("oc,nchw->nohw", weight, jnp.maximum(x, 0.0)) \
        + bias[None, :, None, None]
    assert out.shape == (N, Cout, H, W)
    assert jnp.allclose(out, ref, atol=1e-5, rtol=1e-5)

    print("KERNEL_OK")
</pallas_src>

<mosaic_0001>
module attributes {stable_mosaic.version = 11 : i64} {
  func.func @relu_conv1x1_kernel(%arg0: memref<8x100xf32, #tpu.memory_space<vmem>>, %arg1: memref<3x8xf32, #tpu.memory_space<vmem>>, %arg2: memref<3x100xf32, #tpu.memory_space<vmem>>) attributes {dimension_semantics = [], scalar_prefetch = 0 : i64, scratch_operands = 0 : i64, tpu.core_type = #tpu.core_type<tc>} {
    %c0 = arith.constant 0 : index
    %c0_0 = arith.constant 0 : index
    %0 = vector.load %arg0[%c0, %c0_0] : memref<8x100xf32, #tpu.memory_space<vmem>>, vector<8x100xf32>
    %cst = arith.constant 0.000000e+00 : f32
    %1 = vector.broadcast %cst : f32 to vector<8x100xf32>
    %2 = arith.maximumf %0, %1 : vector<8x100xf32>
    %c0_1 = arith.constant 0 : index
    %c0_2 = arith.constant 0 : index
    %3 = vector.load %arg1[%c0_1, %c0_2] : memref<3x8xf32, #tpu.memory_space<vmem>>, vector<3x8xf32>
    %cst_3 = arith.constant dense<0.000000e+00> : vector<3x100xf32>
    %4 = tpu.matmul %3, %2, %cst_3 {dimension_numbers = #tpu.dot_dimension_numbers<[1], [0], [0], [1], [0, 0, 1, 1], [], []>} : vector<3x8xf32>, vector<8x100xf32>, vector<3x100xf32> -> vector<3x100xf32>
    %c0_4 = arith.constant 0 : index
    %c0_5 = arith.constant 0 : index
    %5 = vector.load %arg2[%c0_4, %c0_5] : memref<3x100xf32, #tpu.memory_space<vmem>>, vector<3x100xf32>
    tpu.vector_store %arg2[%c0_4, %c0_5], %4 {strides = array<i32>} : memref<3x100xf32, #tpu.memory_space<vmem>>, vector<3x100xf32>,
    return
  }
}

</mosaic_0001>

<bundles_post_ra>
// kernel: relu_conv1x1.1
= control target key start
LH: loop header
LB: loop body
LE: loop exit
PB: predicated region body
PF: predicated region fallthrough
CT: control target
= control target key end

     0   :  { %v104_v0 = vmov 0.0   ;;  %vm105_vm0 = vmmov 0   ;;  %vm14_vm1 = vcmask 64512   ;;  %vm88_vm2 = vcmask 813056   ;;  %s130_s0 = inlined_call_operand.vmem [shape: f32[8,100], index: 0, kind: input, shape index: {}]   ;;  %s131_s1 = inlined_call_operand.vmem [shape: f32[3,8], index: 1, kind: input, shape index: {}]   ;;  %s132_s2 = inlined_call_operand.vmem [shape: f32[3,100], index: 2, kind: output, shape index: {}]  }
   0x1   :  { %97 = vmatprep.subr.mxu0 %v104_v0  ;;  %v11_v1 = vld [vmem:[%s130_s0] sm:$0xff]  ;;  %99 = vmatprep.mubr.msk.f32.mxu0 %vm105_vm0, %v104_v0 }
   0x2   :  { %v12_v2 = vmax.f32 %v11_v1, 0.0  ;;  %v13_v3 = vld [vmem:[%s131_s1] sm:$0x7] }
   0x4   :  { %98 = vmatpush3.msra.mxu0 %v12_v2 }
   0x5   :  { %100 = vmatmul.mubr.msk.f32.vlgmr.msra.gmra.mxu0 %vm14_vm1, %v13_v3 }
  0xc5   :  { %v84_v4 = vpop.f32.mrf.mxu0 }
  0xc6   :  { %89 = vst.msk [vmem:[%s132_s2] sm:$0x7] %vm88_vm2, %v84_v4 }
  0xc7   :  { %v101_v5 = vpop.f32.mrf.mxu0 }

</bundles_post_ra>
